<compile_context>
chip_gen: v5e
topology: v5e:2x2
jax: 0.10.0
libtpu: 0.0.40
codegen_flags: <defaults>
</compile_context>

<pallas_src>
import functools

import jax
import jax.numpy as jnp
from jax import lax
from jax.experimental import pallas as pl
from jax.experimental.pallas import tpu as pltpu

_MAX_TM = 512    # row (paragraph) tile cap: multiple of 32 (legal for int8 labels)
_MAX_TT = 2048   # token tile cap: multiple of 128 (lane width)
_STRIP = 32      # in-kernel strip height: int8 sublane tile => aligned dynamic slices


def _round_up(x: int, m: int) -> int:
    return ((x + m - 1) // m) * m


def _choose_tiles(n: int, t: int):
    tt = t if t <= _MAX_TT else _MAX_TT
    if n <= _STRIP:
        tm = n  # full row dim: legal block for every label dtype
    else:
        # Aim for >= 2 row tiles so the "parallel" row axis can shard across
        # both TensorCores on v7x; keep tm a multiple of 32 for 1-byte labels.
        tm = min(_MAX_TM, _round_up(pl.cdiv(n, 2), _STRIP))
    return tm, tt


def _make_rt_loss_kernel(n: int, t: int, tm: int, tt: int, out_w: int):
    need_row_mask = (n % tm) != 0
    need_col_mask = (t % tt) != 0
    lane_chunks = tt // out_w                       # 1 when out_w == tt
    use_strips = (tm % _STRIP == 0) and (tm >= _STRIP)
    n_strips = tm // _STRIP if use_strips else 0
    unroll = max(1, min(4, n_strips))               # modest unroll for LLO scheduling

    def kernel(pt_ref, tag_ref, out_ref):
        i = pl.program_id(0)
        j = pl.program_id(1)

        # Zero the resident per-row-tile accumulator at the start of the
        # token-axis reduction.
        @pl.when(j == 0)
        def _():
            out_ref[...] = jnp.zeros_like(out_ref)

        def tile_ll(p_raw, tag_raw, row_base, col_valid):
            p = p_raw.astype(jnp.float32)           # upcast inside the kernel
            if jnp.issubdtype(tag_raw.dtype, jnp.floating):
                is_pos = tag_raw > 0.5
            else:
                is_pos = tag_raw != 0
            # Hard {0,1} labels: one EUP log per element instead of two.
            arg = jnp.where(is_pos, p, 1.0 - p)
            # Neutralize padded slots BEFORE the log (log(1) == 0) so DMA
            # padding garbage can never produce NaN in the f32 accumulator.
            if need_row_mask:
                rows = lax.broadcasted_iota(jnp.int32, p.shape, 0) + row_base
                arg = jnp.where(rows < n, arg, 1.0)
            if col_valid is not None:
                arg = jnp.where(col_valid, arg, 1.0)
            return jnp.log(arg)

        def fold_lanes(x):
            # (rows, tt) -> (rows, out_w) via static 128-lane-chunk adds
            # (vreg-aligned, pure VPU, no relayout / XLU).
            folded = x[:, 0:out_w]
            for c in range(1, lane_chunks):
                folded = folded + x[:, c * out_w:(c + 1) * out_w]
            return folded

        def fold_sublanes(x):
            # (_STRIP, out_w) -> (8, out_w) via aligned sublane-group adds.
            folded = x[0:8, :]
            for s in range(1, x.shape[0] // 8):
                folded = folded + x[s * 8:(s + 1) * 8, :]
            return folded

        if use_strips:
            # Column-validity mask hoisted out of the strip loop: computed once
            # per tile, and only emitted when the token axis is ragged.
            col_valid = None
            if need_col_mask:
                col_valid = (
                    lax.broadcasted_iota(jnp.int32, (_STRIP, tt), 1) + j * tt
                ) < t

            def strip_body(g, acc):
                off = pl.multiple_of(g * _STRIP, _STRIP)
                ll = tile_ll(
                    pt_ref[pl.ds(off, _STRIP), :],
                    tag_ref[pl.ds(off, _STRIP), :],
                    i * tm + off,
                    col_valid,
                )
                return acc + fold_sublanes(fold_lanes(ll))

            acc = lax.fori_loop(
                0, n_strips, strip_body,
                jnp.zeros((8, out_w), jnp.float32),
                unroll=unroll,
            )
            out_ref[...] += acc
        else:
            # Tiny / irregular row tiles (tm < 32 or not a multiple of 32):
            # whole-tile path, sublane-reduce into accumulator row 0.
            col_valid = None
            if need_col_mask:
                col_valid = (
                    lax.broadcasted_iota(jnp.int32, (tm, tt), 1) + j * tt
                ) < t
            ll = tile_ll(pt_ref[...], tag_ref[...], i * tm, col_valid)
            out_ref[0:1, :] += fold_lanes(jnp.sum(ll, axis=0, keepdims=True))

    return kernel


@functools.partial(jax.jit, static_argnames=("tm", "tt"))
def rt_loss(pt: jax.Array, tagging: jax.Array, *, tm=None, tt=None) -> jax.Array:
    """pt: (N, T, 1) or (N, T) probabilities; tagging: (N, T) hard {0,1} labels."""
    if pt.ndim == 3:
        # Trailing singleton: pure metadata reshape, no extra HBM pass.
        pt = pt.reshape(pt.shape[0], pt.shape[1])
    n, t = pt.shape

    # Stream labels narrow: bool -> int8 keeps the label stream at 1 byte/elem
    # (the previous bf16 cast doubled it).  int8/bf16/f32 labels pass through
    # in their native dtype (the in-kernel compare is dtype-agnostic).
    # TODO(synk): a true bool->int8 bitcast would skip this convert pass
    # entirely, but XLA rejects PRED bitcast-converts; astype keeps the
    # streamed label bytes at 1B/elem either way.
    if tagging.dtype == jnp.bool_:
        tagging = tagging.astype(jnp.int8)

    tm_, tt_ = _choose_tiles(n, t)
    if tm is not None:
        tm_ = tm
    if tt is not None:
        tt_ = tt

    grid = (pl.cdiv(n, tm_), pl.cdiv(t, tt_))
    # Lane-dense partials: fold to 128 lanes whenever the token tile is a
    # multiple of the lane width (unmasked vst, ~zero writeback); otherwise
    # keep the full (ragged) width (equal to the array dim, still legal).
    out_w = 128 if (tt_ % 128 == 0) else tt_

    partials = pl.pallas_call(
        _make_rt_loss_kernel(n, t, tm_, tt_, out_w),
        out_shape=jax.ShapeDtypeStruct((grid[0] * 8, out_w), jnp.float32),
        grid_spec=pltpu.PrefetchScalarGridSpec(
            num_scalar_prefetch=0,
            grid=grid,
            in_specs=[
                pl.BlockSpec((tm_, tt_), lambda i, j: (i, j)),   # pt
                pl.BlockSpec((tm_, tt_), lambda i, j: (i, j)),   # tagging
            ],
            out_specs=pl.BlockSpec((8, out_w), lambda i, j: (i, 0)),
        ),
        compiler_params=pltpu.CompilerParams(
            dimension_semantics=("parallel", "arbitrary"),
            # Default 512x2048 tiles double-buffer to ~10 MiB (f32 labels:
            # ~16 MiB).  Raise the scoped-VMEM limit so v5e's 16 MiB default
            # doesn't shrink pipelining; 32 MiB fits every generation's
            # physical VMEM (v7x: 64 MiB).
            vmem_limit_bytes=32 * 1024 * 1024,
        ),
    )(pt, tagging)

    # Tiny epilogue: sum of per-row-tile lane-dense partials + global scale.
    return -jnp.sum(partials) / (n * t)


def _rt_loss_ref(pt, tagging):
    # Pure-JAX reference mirroring the PyTorch loop (two-log formulation).
    p = pt.reshape(pt.shape[0], pt.shape[1]) if pt.ndim == 3 else pt
    p = p.astype(jnp.float32)
    tg = tagging.astype(jnp.float32)
    n, t = p.shape
    per_row = -(1.0 / t) * jnp.sum(
        tg * jnp.log(p) + (1.0 - tg) * jnp.log(1.0 - p), axis=1
    )
    return jnp.sum(per_row) / n


if __name__ == "__main__":
    key = jax.random.PRNGKey(0)

    def run_case(name, n, t, tag_dtype=None, tm=None, tt=None, salt=0):
        k1, k2 = jax.random.split(jax.random.fold_in(key, salt))
        # Probabilities strictly inside (0, 1), matching sigmoid outputs.
        pt = jax.random.uniform(k1, (n, t, 1), jnp.float32, minval=0.01, maxval=0.99)
        tagging = jax.random.bernoulli(k2, 0.3, (n, t))
        if tag_dtype is not None:
            tagging = tagging.astype(tag_dtype)
        out = rt_loss(pt, tagging, tm=tm, tt=tt)
        jax.block_until_ready(out)
        ref = _rt_loss_ref(pt, tagging)
        if not jnp.allclose(out, ref, rtol=5e-5, atol=1e-6):
            raise AssertionError(f"{name}: kernel={out} ref={ref}")

    # 1) Small case, bool labels streamed as int8; single tile, whole-tile path.
    run_case("small_bool", 8, 256)
    # 2) Multi-tile grid with row masking + custom (non-multiple-of-32) tm:
    #    exercises pl.when init, accumulator, and the whole-tile fallback.
    run_case("tiled_masked", 40, 384, tag_dtype=jnp.float32, tm=16, tt=128, salt=1)
    # 3) Fewer than 8 rows -> sublane-reduce fallback path.
    run_case("tiny_rows", 4, 128, tag_dtype=jnp.float32, salt=2)
    # 4) Strip-mined path with int8 labels and 2 row tiles (megacore split).
    run_case("strips_bool", 64, 512, salt=3)
    # 5) Strip-mined path with both row and column edge masks + 2 token tiles
    #    (T > _MAX_TT) + fori_loop over multiple strips.
    run_case("strips_masked", 96, 2176, salt=4)

    print("KERNEL_OK")
</pallas_src>

<mosaic_0001>
module attributes {stable_mosaic.version = 11 : i64} {
  func.func @kernel(%arg0: i32, %arg1: i32, %arg2: memref<8x256xf32, #tpu.memory_space<vmem>>, %arg3: memref<8x256xi8, #tpu.memory_space<vmem>>, %arg4: memref<8x128xf32, #tpu.memory_space<vmem>>) attributes {dimension_semantics = [#tpu.dimension_semantics<parallel>, #tpu.dimension_semantics<arbitrary>], iteration_bounds = array<i64: 1, 1>, scalar_prefetch = 0 : i64, scratch_operands = 0 : i64, tpu.core_type = #tpu.core_type<tc>, window_params = [{transform_indices = @transform_0, window_bounds = array<i64: 8, 256>}, {transform_indices = @transform_1, window_bounds = array<i64: 8, 256>}, {transform_indices = @transform_2, window_bounds = array<i64: 8, 128>}]} {
    %c0_i32 = arith.constant 0 : i32
    %0 = arith.cmpi eq, %arg1, %c0_i32 : i32
    %1 = arith.extui %0 : i1 to i32
    %c0_i32_0 = arith.constant 0 : i32
    %2 = arith.cmpi ne, %1, %c0_i32_0 : i32
    scf.if %2 {
      %cst_9 = arith.constant 0.000000e+00 : f32
      %19 = vector.broadcast %cst_9 : f32 to vector<8x128xf32>
      %c0_10 = arith.constant 0 : index
      %c0_11 = arith.constant 0 : index
      %20 = vector.load %arg4[%c0_10, %c0_11] : memref<8x128xf32, #tpu.memory_space<vmem>>, vector<8x128xf32>
      tpu.vector_store %arg4[%c0_10, %c0_11], %19 {strides = array<i32>} : memref<8x128xf32, #tpu.memory_space<vmem>>, vector<8x128xf32>,
    } else {
    }
    %c0 = arith.constant 0 : index
    %c0_1 = arith.constant 0 : index
    %3 = vector.load %arg2[%c0, %c0_1] : memref<8x256xf32, #tpu.memory_space<vmem>>, vector<8x256xf32>
    %c0_2 = arith.constant 0 : index
    %c0_3 = arith.constant 0 : index
    %4 = vector.load %arg3[%c0_2, %c0_3] : memref<8x256xi8, #tpu.memory_space<vmem>>, vector<8x256xi8>
    %c0_i8 = arith.constant 0 : i8
    %5 = vector.broadcast %c0_i8 : i8 to vector<8x256xi8>
    %6 = arith.cmpi ne, %4, %5 : vector<8x256xi8>
    %cst = arith.constant 1.000000e+00 : f32
    %7 = vector.broadcast %cst : f32 to vector<8x256xf32>
    %8 = arith.subf %7, %3 : vector<8x256xf32>
    %9 = arith.select %6, %3, %8 : vector<8x256xi1>, vector<8x256xf32>
    %10 = math.log %9 : vector<8x256xf32>
    %c0_4 = arith.constant 0 : index
    %c0_5 = arith.constant 0 : index
    %11 = vector.load %arg4[%c0_4, %c0_5] : memref<8x128xf32, #tpu.memory_space<vmem>>, vector<1x128xf32>
    %cst_6 = arith.constant dense<0.000000e+00> : vector<256xf32>
    %12 = vector.multi_reduction <add>, %10, %cst_6 [0] : vector<8x256xf32> to vector<256xf32>
    %13 = vector.shape_cast %12 : vector<256xf32> to vector<1x256xf32>
    %14 = vector.extract_strided_slice %13 {offsets = [0, 0], sizes = [1, 128], strides = [1, 1]} : vector<1x256xf32> to vector<1x128xf32>
    %15 = vector.extract_strided_slice %13 {offsets = [0, 128], sizes = [1, 128], strides = [1, 1]} : vector<1x256xf32> to vector<1x128xf32>
    %16 = arith.addf %14, %15 : vector<1x128xf32>
    %17 = arith.addf %11, %16 : vector<1x128xf32>
    %c0_7 = arith.constant 0 : index
    %c0_8 = arith.constant 0 : index
    %18 = vector.load %arg4[%c0_7, %c0_8] : memref<8x128xf32, #tpu.memory_space<vmem>>, vector<1x128xf32>
    tpu.vector_store %arg4[%c0_7, %c0_8], %17 {strides = array<i32>} : memref<8x128xf32, #tpu.memory_space<vmem>>, vector<1x128xf32>,
    return
  }
  func.func @transform_0(%arg0: i32, %arg1: i32) -> (i32, i32) {
    %c0_i32 = arith.constant 0 : i32
    return %arg0, %arg1 : i32, i32
  }
  func.func @transform_1(%arg0: i32, %arg1: i32) -> (i32, i32) {
    %c0_i32 = arith.constant 0 : i32
    return %arg0, %arg1 : i32, i32
  }
  func.func @transform_2(%arg0: i32, %arg1: i32) -> (i32, i32) {
    %c0_i32 = arith.constant 0 : i32
    %c0_i32_0 = arith.constant 0 : i32
    return %arg0, %c0_i32 : i32, i32
  }
}

</mosaic_0001>

<bundles_post_ra>
// kernel: rt_loss.1
= control target key start
LH: loop header
LB: loop body
LE: loop exit
PB: predicated region body
PF: predicated region fallthrough
CT: control target
= control target key end

     0   :  { %v61_v0 = vmov 0.0   ;;  %v62_v6 = vmov 0   ;;  %s96_s2 = inlined_call_operand.vmem [shape: f32[8,128], index: 2, kind: output, shape index: {}]   ;;  %s97_s0 = inlined_call_operand.vmem [shape: f32[8,256], index: 0, kind: input, shape index: {}]   ;;  %s98_s1 = inlined_call_operand.vmem [shape: s8[8,256], index: 1, kind: input, shape index: {}]  }
   0x1   :  { %17 = vst [vmem:[%s96_s2] sm:$0xff] %v61_v0  ;;  %v18_v1 = vld [vmem:[%s97_s0] sm:$0xff]  ;;  %v19_v2 = vld [vmem:[%s97_s0 + $0x8] sm:$0xff] }
   0x2   :  { %v20_v3 = vld [vmem:[%s98_s1] sm:$0xf]  ;;  %v22_v4 = vsub.f32 1.0, %v18_v1  ;;  %v23_v5 = vsub.f32 1.0, %v19_v2 }
   0x3   :  { %vm21_vm0 = vnez %v20_v3 }
   0x4   :  { %v24_v7 = vsel %vm21_vm0, 16843009, %v62_v6 }
   0x5   :  { %v25_v8 = vunpack.c.0.s8 %v24_v7  ;;  %v26_v9 = vunpack.c.1.s8 %v24_v7 }
   0x7   :  { %vm27_vm1 = vcmp.ne.s32.totalorder %v25_v8, 0  ;;  %vm28_vm2 = vcmp.ne.s32.totalorder %v26_v9, 0 }
   0x8   :  { %v29_v10 = vsel %vm27_vm1, %v18_v1, %v22_v4  ;;  %v30_v11 = vsel %vm28_vm2, %v19_v2, %v23_v5  ;;  %v35_v28 = vld [vmem:[%s96_s2] sm:$0x1] }
   0x9   :  { %57 = vlog2.f32 %v29_v10 }
   0xa   :  { %59 = vlog2.f32 %v30_v11 }
   0xf   :  { %v58_v12 = vpop.eup %57 }
  0x10   :  { %v60_v13 = vpop.eup %59  ;;  %v32_v14 = vmul.f32 0.6931472, %v58_v12 }
  0x11   :  { %v34_v15 = vmul.f32 0.6931472, %v60_v13 }
  0x12   :  { %v36_v16 = vrot.slane %v32_v14, 4 }
  0x13   :  { %v42_v17 = vrot.slane %v34_v15, 4 }
  0x14   :  { %v37_v18 = vadd.f32 %v36_v16, %v32_v14 }
  0x15   :  { %v43_v19 = vadd.f32 %v42_v17, %v34_v15 }
  0x16   :  { %v38_v20 = vrot.slane %v37_v18, 2 }
  0x17   :  { %v44_v21 = vrot.slane %v43_v19, 2 }
  0x18   :  { %v39_v22 = vadd.f32 %v38_v20, %v37_v18 }
  0x19   :  { %v45_v23 = vadd.f32 %v44_v21, %v43_v19 }
  0x1a   :  { %v40_v24 = vrot.slane %v39_v22, 1 }
  0x1b   :  { %v46_v25 = vrot.slane %v45_v23, 1 }
  0x1c   :  { %v41_v26 = vadd.f32 %v40_v24, %v39_v22 }
  0x1d   :  { %v47_v27 = vadd.f32 %v46_v25, %v45_v23 }
  0x1f   :  { %v48_v29 = vadd.f32 %v47_v27, %v41_v26 }
  0x21   :  { %v49_v30 = vadd.f32 %v48_v29, %v35_v28 }
  0x23   :  { %50 = vst [vmem:[%s96_s2] sm:$0x1] %v49_v30 }

</bundles_post_ra>
